<compile_context>
chip_gen: v6e
topology: v6e:2x2x1
jax: 0.10.0
libtpu: 0.0.40
codegen_flags: <defaults>
</compile_context>

<pallas_src>
import functools

import jax
import jax.numpy as jnp
from jax import lax
from jax.experimental import pallas as pl
from jax.experimental.pallas import tpu as pltpu

LB_SM = 0.2

# murmur3-style 32-bit mixing constants (uint32)
_K1 = 0x9E3779B9
_K2 = 0xCC9E2D51
_M1 = 0x85EBCA6B
_M2 = 0xC2B2AE35


def _uniform_mul(seed_u32, row_u32, col_u32, lb_sm):
    """Counter-based hash -> per-element uniform in [0, 2*lb_sm).

    row_u32/col_u32: uint32 arrays of global element coordinates.
    Works identically inside the Pallas kernel and in plain JAX (reference).
    """
    h = row_u32 * jnp.uint32(_K1) + col_u32 * jnp.uint32(_K2) + seed_u32
    h = h ^ (h >> jnp.uint32(16))
    h = h * jnp.uint32(_M1)
    h = h ^ (h >> jnp.uint32(13))
    h = h * jnp.uint32(_M2)
    h = h ^ (h >> jnp.uint32(16))
    u24 = (h >> jnp.uint32(8)).astype(jnp.int32)          # in [0, 2^24)
    # single fused scale: uniform [0,1) * 2*lb_sm
    return u24.astype(jnp.float32) * (2.0 * lb_sm / float(1 << 24))


def _abs_disc_kernel(seed_ref, x_ref, labels_ref, out_ref, acc_ref, *,
                     lb_sm, n_true, tn, tc):
    ci = pl.program_id(0)   # class-tile index (parallel)
    ni = pl.program_id(1)   # batch-tile index (reduction, last grid axis)

    @pl.when(ni == 0)
    def _():
        acc_ref[...] = jnp.zeros_like(acc_ref)

    # Global element coordinates for this tile; they drive the hash so every
    # grid block draws independent uniforms (no replayed randomness per tile).
    row = (lax.broadcasted_iota(jnp.int32, (tn, tc), 0) + ni * tn).astype(jnp.uint32)
    col = (lax.broadcasted_iota(jnp.int32, (tn, tc), 1) + ci * tc).astype(jnp.uint32)
    seed_u32 = seed_ref[0].astype(jnp.uint32)
    mul = _uniform_mul(seed_u32, row, col, lb_sm)

    lab = labels_ref[...]
    # |x - (1 - mul)*labels| == |x - labels + mul*labels|
    loss = jnp.abs(x_ref[...] - lab + mul * lab)

    # Per-tile reduction as VPU adds into an (8, tc) accumulator; layout-free
    # reshape keeps the minor (8, tc) = (sublane, lane) dims intact.
    acc_ref[...] += loss.reshape(tn // 8, 8, tc).sum(axis=0)

    @pl.when(ni == pl.num_programs(1) - 1)
    def _():
        # Single cross-sublane (XLU) reduce + normalize + lane-dense store.
        total = jnp.sum(acc_ref[...], axis=0, keepdims=True)        # (1, tc)
        out_ref[...] = (total * (1.0 / float(n_true))).astype(out_ref.dtype)


def _round_up(v, m):
    return (v + m - 1) // m * m


def abs_disc_sm_v3_uniform(x, labels, seed, lb_sm=LB_SM,
                           max_tn=512, max_tc=2048):
    """x, labels: (N, C) float32 in [0, 1]. seed: (1,) int32. Returns (C,) f32."""
    assert x.shape == labels.shape and x.ndim == 2
    N, C = x.shape

    # Tile sizes: sublane-aligned batch tiles, lane-dense class tiles.
    tn = min(max_tn, _round_up(N, 8))
    tc = min(max_tc, _round_up(C, 128))
    n_pad = _round_up(N, tn)
    c_pad = _round_up(C, tc)
    if (n_pad, c_pad) != (N, C):
        # Zero padding: padded rows/cols give |0 - (1-mul)*0| = 0, so the
        # accumulated sum (and thus the mean over the true batch) is unchanged.
        x = jnp.pad(x, ((0, n_pad - N), (0, c_pad - C)))
        labels = jnp.pad(labels, ((0, n_pad - N), (0, c_pad - C)))

    grid = (c_pad // tc, n_pad // tn)   # (parallel C tiles, reduction N tiles last)

    out = pl.pallas_call(
        functools.partial(_abs_disc_kernel, lb_sm=lb_sm, n_true=N, tn=tn, tc=tc),
        out_shape=jax.ShapeDtypeStruct((1, c_pad), jnp.float32),
        grid=grid,
        in_specs=[
            pl.BlockSpec(memory_space=pltpu.MemorySpace.SMEM),      # seed scalar
            pl.BlockSpec((tn, tc), lambda ci, ni: (ni, ci)),        # x
            pl.BlockSpec((tn, tc), lambda ci, ni: (ni, ci)),        # labels
        ],
        out_specs=pl.BlockSpec((1, tc), lambda ci, ni: (0, ci)),
        scratch_shapes=[pltpu.VMEM((8, tc), jnp.float32)],
        compiler_params=pltpu.CompilerParams(
            dimension_semantics=("parallel", "arbitrary"),
            vmem_limit_bytes=40 * 1024 * 1024,
        ),
    )(seed, x, labels)
    return out[0, :C]


def _reference(x, labels, seed, lb_sm=LB_SM):
    """Plain-JAX reference using the identical hash-based uniform draw."""
    N, C = x.shape
    row = jnp.broadcast_to(jnp.arange(N, dtype=jnp.uint32)[:, None], (N, C))
    col = jnp.broadcast_to(jnp.arange(C, dtype=jnp.uint32)[None, :], (N, C))
    mul = _uniform_mul(seed[0].astype(jnp.uint32), row, col, lb_sm)
    labels2 = (1.0 - mul) * labels
    return jnp.mean(jnp.abs(x - labels2), axis=0)


if __name__ == "__main__":
    key = jax.random.PRNGKey(0)
    kx, kl = jax.random.split(key)

    # Small, non-lane-aligned shapes to exercise the padding path.
    N, C = 16, 100
    x = jax.random.uniform(kx, (N, C), dtype=jnp.float32)        # in [0, 1)
    labels = jax.random.uniform(kl, (N, C), dtype=jnp.float32)   # in [0, 1)
    seed = jnp.array([0], dtype=jnp.int32)

    # Mirror the PyTorch asserts (inputs must lie in [0, 1]).
    assert bool(jnp.all((x >= 0) & (x <= 1))), "x is wrong"
    assert bool(jnp.all((labels >= 0) & (labels <= 1))), "labels is wrong"

    loss = abs_disc_sm_v3_uniform(x, labels, seed, lb_sm=LB_SM)
    loss = jax.block_until_ready(loss)

    # Shape / range sanity + exact check against the plain-JAX reference that
    # uses the same per-element uniform draws.
    assert loss.shape == (C,)
    assert bool(jnp.all(jnp.isfinite(loss)))
    assert bool(jnp.all((loss >= 0.0) & (loss <= 1.0)))
    ref = _reference(x, labels, seed, lb_sm=LB_SM)
    assert bool(jnp.allclose(loss, ref, rtol=1e-5, atol=1e-6)), "mismatch vs reference"

    print("KERNEL_OK")
</pallas_src>

<mosaic_0001>
module attributes {stable_mosaic.version = 11 : i64} {
  func.func @_abs_disc_kernel(%arg0: i32, %arg1: i32, %arg2: memref<1xi32, #tpu.memory_space<smem>>, %arg3: memref<16x128xf32, #tpu.memory_space<vmem>>, %arg4: memref<16x128xf32, #tpu.memory_space<vmem>>, %arg5: memref<1x128xf32, #tpu.memory_space<vmem>>, %arg6: memref<8x128xf32, #tpu.memory_space<vmem>>) attributes {dimension_semantics = [#tpu.dimension_semantics<parallel>, #tpu.dimension_semantics<arbitrary>], iteration_bounds = array<i64: 1, 1>, scalar_prefetch = 0 : i64, scratch_operands = 1 : i64, tpu.core_type = #tpu.core_type<tc>, window_params = [{transform_indices = @transform_0, window_bounds = array<i64: 1>}, {transform_indices = @transform_1, window_bounds = array<i64: 16, 128>}, {transform_indices = @transform_2, window_bounds = array<i64: 16, 128>}, {transform_indices = @transform_3, window_bounds = array<i64: 1, 128>}]} {
    %c0_i32 = arith.constant 0 : i32
    %0 = arith.cmpi eq, %arg1, %c0_i32 : i32
    %1 = arith.extui %0 : i1 to i32
    %c0_i32_0 = arith.constant 0 : i32
    %2 = arith.cmpi ne, %1, %c0_i32_0 : i32
    scf.if %2 {
      %cst_14 = arith.constant 0.000000e+00 : f32
      %51 = vector.broadcast %cst_14 : f32 to vector<8x128xf32>
      %c0_15 = arith.constant 0 : index
      %c0_16 = arith.constant 0 : index
      %52 = vector.load %arg6[%c0_15, %c0_16] : memref<8x128xf32, #tpu.memory_space<vmem>>, vector<8x128xf32>
      tpu.vector_store %arg6[%c0_15, %c0_16], %51 {strides = array<i32>} : memref<8x128xf32, #tpu.memory_space<vmem>>, vector<8x128xf32>,
    } else {
    }
    %3 = tpu.iota {dimensions = array<i32: 0>} : vector<16x128xi32>
    %c16_i32 = arith.constant 16 : i32
    %4 = arith.muli %arg1, %c16_i32 : i32
    %5 = vector.broadcast %4 : i32 to vector<16x128xi32>
    %6 = arith.addi %3, %5 : vector<16x128xi32>
    %7 = tpu.iota {dimensions = array<i32: 1>} : vector<16x128xi32>
    %c128_i32 = arith.constant 128 : i32
    %8 = arith.muli %arg0, %c128_i32 : i32
    %9 = vector.broadcast %8 : i32 to vector<16x128xi32>
    %10 = arith.addi %7, %9 : vector<16x128xi32>
    %c0 = arith.constant 0 : index
    %11 = memref.load %arg2[%c0] : memref<1xi32, #tpu.memory_space<smem>>
    %c-1640531527_i32 = arith.constant -1640531527 : i32
    %12 = vector.broadcast %c-1640531527_i32 : i32 to vector<16x128xi32>
    %13 = arith.muli %6, %12 : vector<16x128xi32>
    %c-862048943_i32 = arith.constant -862048943 : i32
    %14 = vector.broadcast %c-862048943_i32 : i32 to vector<16x128xi32>
    %15 = arith.muli %10, %14 : vector<16x128xi32>
    %16 = arith.addi %13, %15 : vector<16x128xi32>
    %17 = vector.broadcast %11 : i32 to vector<16x128xi32>
    %18 = arith.addi %16, %17 : vector<16x128xi32>
    %c16_i32_1 = arith.constant 16 : i32
    %19 = vector.broadcast %c16_i32_1 : i32 to vector<16x128xi32>
    %20 = arith.shrui %18, %19 : vector<16x128xi32>
    %21 = arith.xori %18, %20 : vector<16x128xi32>
    %c-2048144789_i32 = arith.constant -2048144789 : i32
    %22 = vector.broadcast %c-2048144789_i32 : i32 to vector<16x128xi32>
    %23 = arith.muli %21, %22 : vector<16x128xi32>
    %c13_i32 = arith.constant 13 : i32
    %24 = vector.broadcast %c13_i32 : i32 to vector<16x128xi32>
    %25 = arith.shrui %23, %24 : vector<16x128xi32>
    %26 = arith.xori %23, %25 : vector<16x128xi32>
    %c-1028477387_i32 = arith.constant -1028477387 : i32
    %27 = vector.broadcast %c-1028477387_i32 : i32 to vector<16x128xi32>
    %28 = arith.muli %26, %27 : vector<16x128xi32>
    %c16_i32_2 = arith.constant 16 : i32
    %29 = vector.broadcast %c16_i32_2 : i32 to vector<16x128xi32>
    %30 = arith.shrui %28, %29 : vector<16x128xi32>
    %31 = arith.xori %28, %30 : vector<16x128xi32>
    %c8_i32 = arith.constant 8 : i32
    %32 = vector.broadcast %c8_i32 : i32 to vector<16x128xi32>
    %33 = arith.shrui %31, %32 : vector<16x128xi32>
    %34 = arith.sitofp %33 : vector<16x128xi32> to vector<16x128xf32>
    %cst = arith.constant 2.38418583E-8 : f32
    %35 = vector.broadcast %cst : f32 to vector<16x128xf32>
    %36 = arith.mulf %34, %35 : vector<16x128xf32>
    %c0_3 = arith.constant 0 : index
    %c0_4 = arith.constant 0 : index
    %37 = vector.load %arg4[%c0_3, %c0_4] : memref<16x128xf32, #tpu.memory_space<vmem>>, vector<16x128xf32>
    %c0_5 = arith.constant 0 : index
    %c0_6 = arith.constant 0 : index
    %38 = vector.load %arg3[%c0_5, %c0_6] : memref<16x128xf32, #tpu.memory_space<vmem>>, vector<16x128xf32>
    %39 = arith.subf %38, %37 : vector<16x128xf32>
    %40 = arith.mulf %36, %37 : vector<16x128xf32>
    %41 = arith.addf %39, %40 : vector<16x128xf32>
    %42 = math.absf %41 : vector<16x128xf32>
    %c0_7 = arith.constant 0 : index
    %c0_8 = arith.constant 0 : index
    %43 = vector.load %arg6[%c0_7, %c0_8] : memref<8x128xf32, #tpu.memory_space<vmem>>, vector<8x128xf32>
    %44 = vector.shape_cast %42 : vector<16x128xf32> to vector<2x8x128xf32>
    %cst_9 = arith.constant dense<0.000000e+00> : vector<8x128xf32>
    %45 = vector.multi_reduction <add>, %44, %cst_9 [0] : vector<2x8x128xf32> to vector<8x128xf32>
    %46 = arith.addf %43, %45 : vector<8x128xf32>
    %c0_10 = arith.constant 0 : index
    %c0_11 = arith.constant 0 : index
    %47 = vector.load %arg6[%c0_10, %c0_11] : memref<8x128xf32, #tpu.memory_space<vmem>>, vector<8x128xf32>
    tpu.vector_store %arg6[%c0_10, %c0_11], %46 {strides = array<i32>} : memref<8x128xf32, #tpu.memory_space<vmem>>, vector<8x128xf32>,
    %c0_i32_12 = arith.constant 0 : i32
    %48 = arith.cmpi eq, %arg1, %c0_i32_12 : i32
    %49 = arith.extui %48 : i1 to i32
    %c0_i32_13 = arith.constant 0 : i32
    %50 = arith.cmpi ne, %49, %c0_i32_13 : i32
    scf.if %50 {
      %c0_14 = arith.constant 0 : index
      %c0_15 = arith.constant 0 : index
      %51 = vector.load %arg6[%c0_14, %c0_15] : memref<8x128xf32, #tpu.memory_space<vmem>>, vector<8x128xf32>
      %cst_16 = arith.constant dense<0.000000e+00> : vector<128xf32>
      %52 = vector.multi_reduction <add>, %51, %cst_16 [0] : vector<8x128xf32> to vector<128xf32>
      %53 = vector.shape_cast %52 : vector<128xf32> to vector<1x128xf32>
      %cst_17 = arith.constant 6.250000e-02 : f32
      %54 = vector.broadcast %cst_17 : f32 to vector<1x128xf32>
      %55 = arith.mulf %53, %54 : vector<1x128xf32>
      %c0_18 = arith.constant 0 : index
      %c0_19 = arith.constant 0 : index
      %56 = vector.load %arg5[%c0_18, %c0_19] : memref<1x128xf32, #tpu.memory_space<vmem>>, vector<1x128xf32>
      tpu.vector_store %arg5[%c0_18, %c0_19], %55 {strides = array<i32>} : memref<1x128xf32, #tpu.memory_space<vmem>>, vector<1x128xf32>,
    } else {
    }
    return
  }
  func.func @transform_0(%arg0: i32, %arg1: i32) -> i32 {
    %c0_i32 = arith.constant 0 : i32
    %c0_i32_0 = arith.constant 0 : i32
    return %c0_i32 : i32
  }
  func.func @transform_1(%arg0: i32, %arg1: i32) -> (i32, i32) {
    %c0_i32 = arith.constant 0 : i32
    return %arg1, %arg0 : i32, i32
  }
  func.func @transform_2(%arg0: i32, %arg1: i32) -> (i32, i32) {
    %c0_i32 = arith.constant 0 : i32
    return %arg1, %arg0 : i32, i32
  }
  func.func @transform_3(%arg0: i32, %arg1: i32) -> (i32, i32) {
    %c0_i32 = arith.constant 0 : i32
    %c0_i32_0 = arith.constant 0 : i32
    return %c0_i32, %arg0 : i32, i32
  }
}

</mosaic_0001>

<bundles_post_ra>
// kernel: tpu_custom_call.1
= control target key start
LH: loop header
LB: loop body
LE: loop exit
PB: predicated region body
PF: predicated region fallthrough
CT: control target
= control target key end

     0   :  { %9 = vsyncpa [#allocation5], 0  ;;  %s244_s0 = inlined_call_operand.<no memory space> [shape: s32[1], index: 0, kind: input, shape index: {}]   ;;  %s245_s1 = inlined_call_operand.hbm [shape: f32[16,128], index: 1, kind: input, shape index: {}]   ;;  %s246_s2 = inlined_call_operand.hbm [shape: f32[16,128], index: 2, kind: input, shape index: {}]   ;;  %s247_s3 = inlined_call_operand.hbm [shape: f32[1,128], index: 3, kind: output, shape index: {}]  }
   0x1   :  { %10 = vsyncpa [#allocation8], 0 }
   0x2   :  { %11 = vsyncpa [#allocation6], 0  ;;  %s207_s12 = smov [#allocation4]  }
   0x3   :  { %s19_s13 = sshll.u32 %s207_s12, 4  ;;  %s20_s13 = int_to_ptr.vmem [resolvable:$true] %s19_s13 }
   0x4   :  { %s149_s14 = scalar_lea.vmem %s20_s13, 256  ;;  %p154_p1 = scmp.lt.s32.totalorder %s20_s13, %s20_s13 }
   0x5   :  { %p150_p0 = scmp.ne.s32.totalorder %s20_s13, %s149_s14  ;;  %p155_p2 = scmp.lt.s32.totalorder %s149_s14, %s149_s14 }
   0x7   :  { %p156_p3 = por %p155_p2, %p154_p1 }
   0x9   :  { %p157_p4 = pnand %p156_p3, %p150_p0 }
   0xb   :  { %160 = shalt.err (!%p157_p4)
}
   0xc   :  { %s208_s15 = smov 128   ;;  %s209_s16 = smov 8  }
   0xd   :  { %25 = dma.hbm_to_vmem [thread:$0]  %s245_s1, 256, %s20_s13, [#allocation5], %s208_s15, %s208_s15, %s209_s16  }
   0xe   :  { %s210_s19 = smov [#allocation7]  }
   0xf   :  { %s31_s20 = sshll.u32 %s210_s19, 4  ;;  %s32_s20 = int_to_ptr.vmem [resolvable:$true] %s31_s20 }
  0x10   :  { %s169_s21 = scalar_lea.vmem %s32_s20, 256  ;;  %p174_p6 = scmp.lt.s32.totalorder %s32_s20, %s32_s20 }
  0x11   :  { %p170_p5 = scmp.ne.s32.totalorder %s32_s20, %s169_s21  ;;  %p175_p7 = scmp.lt.s32.totalorder %s169_s21, %s169_s21 }
  0x13   :  { %p176_p8 = por %p175_p7, %p174_p6 }
  0x15   :  { %p177_p9 = pnand %p176_p8, %p170_p5 }
  0x17   :  { %180 = shalt.err (!%p177_p9)
}
  0x18   :  { %37 = dma.hbm_to_vmem [thread:$0]  %s246_s2, 256, %s32_s20, [#allocation8], %s208_s15, %s208_s15, %s209_s16  }
  0x19   :  { %201 = dma.done.wait [#allocation5], 256  }
  0x1a   :  { %202 = vsyncadd [#allocation5], 4294967040 }
  0x1b   :  { %203 = dma.done.wait [#allocation8], 256  }
  0x1c   :  { %204 = vsyncadd [#allocation8], 4294967040  ;;  %v49_v0 = vlaneseq  ;;  %v67_v6 = vstv %s244_s0  ;;  %v92_v29 = vld [vmem:[#allocation7] sm:$0xff]  ;;  %v94_v30 = vld [vmem:[#allocation4] sm:$0xff]  ;;  %s211_s0 = smov [#allocation9]  }
  0x1d   :  { %v93_v33 = vld [vmem:[#allocation7 + $0x8] sm:$0xff]  ;;  %v95_v34 = vld [vmem:[#allocation4 + $0x8] sm:$0xff]  ;;  %v96_v37 = vsub.f32 %v94_v30, %v92_v29  ;;  %s126_s2 = sshll.u32 %s211_s0, 4  ;;  %s127_s2 = int_to_ptr.vmem [resolvable:$true] %s126_s2 }
  0x1e   :  { %v50_v1 = vshrl.u32 %v49_v0, 7  ;;  %v57_v2 = vand.u32 127, %v49_v0  ;;  %v97_v39 = vsub.f32 %v95_v34, %v93_v33  ;;  %s181_s25 = scalar_lea.vmem %s127_s2, 16  ;;  %s185_s26 = scalar_lea.vmem %s127_s2, 32 }
  0x1f   :  { %p182_p10 = scmp.ne.s32.totalorder %s127_s2, %s181_s25  ;;  %p186_p11 = scmp.lt.s32.totalorder %s127_s2, %s127_s2 }
  0x20   :  { %v51_v3 = vadd.s32 8, %v50_v1  ;;  %v62_v4 = vmul.u32 2654435769, %v50_v1  ;;  %v64_v5 = vmul.u32 3432918353, %v57_v2  ;;  %p187_p12 = scmp.lt.s32.totalorder %s185_s26, %s181_s25 }
  0x22   :  { %v63_v7 = vmul.u32 2654435769, %v51_v3  ;;  %v65_v8 = vadd.s32 %v64_v5, %v62_v4  ;;  %p188_p13 = por %p187_p12, %p186_p11 }
  0x24   :  { %v66_v9 = vadd.s32 %v64_v5, %v63_v7  ;;  %v68_v10 = vadd.s32 %v67_v6, %v65_v8  ;;  %p189_p0 = pnand %p188_p13, %p182_p10 }
  0x26   :  { %v69_v11 = vadd.s32 %v67_v6, %v66_v9  ;;  %v70_v12 = vshrl.u32 %v68_v10, 16 }
  0x28   :  { %v71_v13 = vshrl.u32 %v69_v11, 16  ;;  %v72_v14 = vxor.u32 %v70_v12, %v68_v10 }
  0x2a   :  { %v73_v15 = vxor.u32 %v71_v13, %v69_v11  ;;  %v74_v16 = vmul.u32 2246822507, %v72_v14 }
  0x2c   :  { %v75_v17 = vmul.u32 2246822507, %v73_v15  ;;  %v76_v18 = vshrl.u32 %v74_v16, 13 }
  0x2e   :  { %v77_v19 = vshrl.u32 %v75_v17, 13  ;;  %v78_v20 = vxor.u32 %v76_v18, %v74_v16 }
  0x30   :  { %v79_v21 = vxor.u32 %v77_v19, %v75_v17  ;;  %v80_v22 = vmul.u32 3266489909, %v78_v20 }
  0x32   :  { %v81_v23 = vmul.u32 3266489909, %v79_v21  ;;  %v82_v24 = vshrl.u32 %v80_v22, 16 }
  0x34   :  { %v83_v25 = vshrl.u32 %v81_v23, 16  ;;  %v84_v26 = vxor.u32 %v82_v24, %v80_v22 }
  0x36   :  { %v85_v27 = vxor.u32 %v83_v25, %v81_v23  ;;  %v86_v28 = vshrl.u32 %v84_v26, 8 }
  0x38   :  { %v87_v31 = vshrl.u32 %v85_v27, 8  ;;  %v88_v32 = vcvt.s32.f32 %v86_v28 }
  0x3a   :  { %v89_v35 = vcvt.s32.f32 %v87_v31  ;;  %v90_v36 = vmul.f32 2.3841858e-08, %v88_v32 }
  0x3c   :  { %v91_v38 = vmul.f32 2.3841858e-08, %v89_v35  ;;  %v98_v40 = vmul.f32 %v92_v29, %v90_v36 }
  0x3e   :  { %v99_v41 = vmul.f32 %v93_v33, %v91_v38  ;;  %v100_v42 = vadd.f32 %v98_v40, %v96_v37 }
  0x40   :  { %v101_v43 = vadd.f32 %v99_v41, %v97_v39  ;;  %v102_v44 = vand.u32 2147483647, %v100_v42 }
  0x42   :  { %v103_v45 = vand.u32 2147483647, %v101_v43 }
  0x44   :  { %v105_v46 = vadd.f32 %v103_v45, %v102_v44 }
  0x46   :  { %v112_v47 = vrot.slane %v105_v46, 4 }
  0x48   :  { %v113_v48 = vadd.f32 %v112_v47, %v105_v46 }
  0x4a   :  { %v114_v49 = vrot.slane %v113_v48, 2 }
  0x4c   :  { %v115_v50 = vadd.f32 %v114_v49, %v113_v48 }
  0x4e   :  { %v116_v51 = vrot.slane %v115_v50, 1 }
  0x50   :  { %v117_v52 = vadd.f32 %v116_v51, %v115_v50 }
  0x52   :  { %v118_v53 = vmul.f32 0.0625, %v117_v52 }
  0x54   :  { %119 = vst [vmem:[#allocation9] sm:$0x1] %v118_v53 }
  0x55   :  { %192 = shalt.err (!%p189_p0)
}
  0x56   :  { %129 = dma.vmem_to_hbm [thread:$0]  %s127_s2, 16, %s247_s3, [#allocation6]  }
  0x57   :  { %205 = dma.done.wait [#allocation6], 16  }
  0x58   :  { %206 = vsyncadd [#allocation6], 4294967280 }
  0x59   :  { %133 = vsyncpa [#allocation5], 1 }
  0x5a   :  { %134 = vsyncpa [#allocation8], 1 }
  0x5b   :  { %135 = vsyncpa [#allocation6], 1 }

</bundles_post_ra>
